<compile_context>
chip_gen: v5e
topology: v5e:2x2
jax: 0.10.0
libtpu: 0.0.40
codegen_flags: <defaults>
</compile_context>

<pallas_src>
import jax
import jax.numpy as jnp
from jax.experimental import pallas as pl
from jax.experimental.pallas import tpu as pltpu


# ----------------------------- kernels ------------------------------------ #

def _planar_body(scalars_ref, z_ref, wbd_ref, sel_u_ref):
    b = scalars_ref[0]                                   # scalar bias (SMEM)
    z = z_ref[...].astype(jnp.float32)                   # cast AFTER the load

    # Per-group matvec on the MXU: column j of wbd holds w in lanes
    # [j*D, (j+1)*D) and zeros elsewhere, so a[:, j] = (packed row-group j) . w.
    a = jnp.dot(z, wbd_ref[...],
                precision=jax.lax.Precision.HIGHEST,
                preferred_element_type=jnp.float32) + b            # (tn, P)
    t = jnp.tanh(a)                                                # (tn, P)

    # Broadcast u_hat * tanh back to each D-lane group via the u_hat-scaled
    # 0/1 selector (second MXU matmul; keep HIGHEST so tanh isn't truncated).
    ut = jnp.dot(t, sel_u_ref[...],
                 precision=jax.lax.Precision.HIGHEST,
                 preferred_element_type=jnp.float32)               # (tn, Dp)
    return z + ut, t


def _planar_flow_kernel(scalars_ref, z_ref, wbd_ref, sel_u_ref, out_ref):
    out, _ = _planar_body(scalars_ref, z_ref, wbd_ref, sel_u_ref)
    out_ref[...] = out.astype(out_ref.dtype)


def _planar_flow_kernel_logdet(scalars_ref, z_ref, wbd_ref, sel_u_ref,
                               out_ref, logdet_ref):
    out, t = _planar_body(scalars_ref, z_ref, wbd_ref, sel_u_ref)
    out_ref[...] = out.astype(out_ref.dtype)
    wu = scalars_ref[1]                                  # w . u_hat (SMEM)
    dt = 1.0 - t * t
    # logabsdet: log|1 + dtanh(z @ w + b) * (w . u_hat)|   -> (tn, P)
    logdet_ref[...] = jnp.log(jnp.abs(1.0 + dt * wu))


# ----------------------------- wrapper ------------------------------------ #

def _tpu_kind():
    try:
        return (getattr(jax.devices()[0], "device_kind", "") or "").lower()
    except Exception:
        return ""


def planar_flow_forward(z, w, u, b, return_logabsdet=False, block_bytes=None):
    """JAX/Pallas equivalent of PlanarFlow.forward.

    z: (N, D); w: (D, 1); u: (1, D); b: (1, 1)  (same shapes as the torch module).
    """
    N, D = z.shape
    out_dtype = z.dtype
    elem_bytes = jnp.dtype(z.dtype).itemsize

    # --- parameter reparameterization (plain-JAX glue, O(D)) ---
    w_row = w.reshape(1, D).astype(jnp.float32)
    u32 = u.astype(jnp.float32)
    w_dot_u = jnp.sum(u32 * w_row)
    m_val = -1.0 + jax.nn.softplus(w_dot_u + 0.5413)
    u_hat = u32 + (m_val - w_dot_u) * w_row / jnp.sum(w_row ** 2)      # (1, D)
    wu = jnp.sum(w_row * u_hat)                                        # scalar (grid-invariant)
    b32 = b.reshape(()).astype(jnp.float32)

    # --- lane-dense packing: P rows of width D -> one 128-lane row ---
    P = 128 // D if (0 < D <= 128 and 128 % D == 0) else 1
    Dp = P * D
    N_main = (N // P) * P                 # aligned prefix handled by the kernel
    Np = N_main // P

    out_main = ld_main = None
    if Np > 0:
        # Native-dtype packing is a free row-major reshape (no copy, no cast).
        z_main = (z if N_main == N else z[:N_main]).reshape(Np, Dp)

        # Block-diagonal matvec weights + u_hat-scaled broadcast selector.
        sel = jnp.repeat(jnp.eye(P, dtype=jnp.float32), D, axis=1)     # (P, Dp)
        w_bd = sel.T * jnp.tile(w_row.reshape(-1), P)[:, None]         # (Dp, P)
        sel_u = sel * jnp.tile(u_hat, (1, P))                          # (P, Dp)
        scalars = jnp.stack([b32, wu])                                 # (2,) -> SMEM

        # --- per-generation tile / VMEM budget ---
        kind = _tpu_kind()
        is_v7 = "7" in kind
        if block_bytes is None:
            if "v5 lite" in kind or "v5e" in kind:
                block_bytes = 2 << 20      # lowest HBM BW; small VMEM envelope
            elif is_v7:
                block_bytes = 3 << 20      # 64 MiB physical VMEM on v7x
            elif "v6" in kind:
                block_bytes = 6 << 20      # 128 MiB VMEM / 1.4 TB/s: big tiles
            else:
                block_bytes = 4 << 20
        vmem_cap = (48 << 20) if is_v7 else (96 << 20)

        pack = max(1, 4 // elem_bytes)     # sub-32-bit dtypes pack along sublanes
        g = 8 * pack                       # sublane granularity of the z/out tile
        row_bytes = Dp * elem_bytes
        # double-buffered z + out tiles, plus the lane-padded (to 128) logdet block
        row_pipe = 2 * (2 * row_bytes + (128 * 4 if return_logabsdet else 0))

        rows = max(g, (block_bytes // row_bytes) // g * g)
        rows = min(rows, max(g, ((vmem_cap - (8 << 20)) // row_pipe) // g * g))
        # aim for >= 2 grid steps so v7x's second TensorCore gets work
        half_rows = ((pl.cdiv(Np, 2) + g - 1) // g) * g
        tn = min(rows, max(g, half_rows))
        grid = (pl.cdiv(Np, tn),)
        vmem_limit = int(min(vmem_cap, tn * row_pipe + (4 << 20)))

        cost = pl.CostEstimate(
            flops=6 * N_main * D,
            transcendentals=2 * N_main,
            bytes_accessed=2 * N_main * D * elem_bytes + 4 * N_main,
        )

        in_specs = [
            pl.BlockSpec(memory_space=pltpu.MemorySpace.SMEM),   # b, w.u_hat scalars
            pl.BlockSpec((tn, Dp), lambda i: (i, 0)),            # z (packed, pipelined)
            pl.BlockSpec((Dp, P), lambda i: (0, 0)),             # block-diagonal w
            pl.BlockSpec((P, Dp), lambda i: (0, 0)),             # u_hat-scaled selector
        ]
        params = pltpu.CompilerParams(dimension_semantics=("parallel",),
                                      vmem_limit_bytes=vmem_limit)

        if return_logabsdet:
            out_p, logdet_p = pl.pallas_call(
                _planar_flow_kernel_logdet,
                out_shape=(jax.ShapeDtypeStruct((Np, Dp), out_dtype),
                           jax.ShapeDtypeStruct((Np, P), jnp.float32)),
                grid=grid,
                in_specs=in_specs,
                out_specs=(pl.BlockSpec((tn, Dp), lambda i: (i, 0)),
                           pl.BlockSpec((tn, P), lambda i: (i, 0))),
                compiler_params=params,
                cost_estimate=cost,
            )(scalars, z_main, w_bd, sel_u)
            out_main = out_p.reshape(N_main, D)      # free reshape
            ld_main = logdet_p.reshape(N_main)       # row-major -> original order
        else:
            out_p = pl.pallas_call(
                _planar_flow_kernel,
                out_shape=jax.ShapeDtypeStruct((Np, Dp), out_dtype),
                grid=grid,
                in_specs=in_specs,
                out_specs=pl.BlockSpec((tn, Dp), lambda i: (i, 0)),
                compiler_params=params,
                cost_estimate=cost,
            )(scalars, z_main, w_bd, sel_u)
            out_main = out_p.reshape(N_main, D)

    # --- ragged tail (< P rows): tiny pure-JAX epilogue, no z padding/copy ---
    out_tail = ld_tail = None
    if N_main < N:
        z_t = z[N_main:].astype(jnp.float32)                       # (<P, D)
        a_t = jnp.dot(z_t, w_row.T, precision=jax.lax.Precision.HIGHEST) + b32
        t_t = jnp.tanh(a_t)
        out_tail = (z_t + u_hat * t_t).astype(out_dtype)
        if return_logabsdet:
            ld_tail = jnp.log(jnp.abs(1.0 + (1.0 - t_t ** 2) * wu)).reshape(-1)

    if out_main is None:
        out, ld = out_tail, ld_tail
    elif out_tail is None:
        out, ld = out_main, ld_main
    else:
        out = jnp.concatenate([out_main, out_tail], axis=0)
        ld = (jnp.concatenate([ld_main, ld_tail], axis=0)
              if return_logabsdet else None)

    if return_logabsdet:
        return out, ld                     # .view(-1) in torch
    return out


def planar_flow_ref(z, w, u, b):
    """Pure-JAX reference (direct transcription of the torch module)."""
    w_dot_u = jnp.squeeze(u @ w)
    u_hat = u + (-1.0 + jax.nn.softplus(w_dot_u + 0.5413) - w_dot_u) * w.T / jnp.sum(w ** 2)
    a = jnp.dot(z, w, precision=jax.lax.Precision.HIGHEST) + b
    t = jnp.tanh(a)
    out = z + u_hat * t
    logdet = jnp.log(jnp.abs(
        1.0 + jnp.dot((1.0 - t ** 2) * w.T, u_hat.T,
                      precision=jax.lax.Precision.HIGHEST))).reshape(-1)
    return out, logdet


if __name__ == "__main__":
    key = jax.random.PRNGKey(0)
    N, D = 8, 32  # small shapes implied by the module: seq=8, hidden=32
    kw, kb, kz, ku, kz2, kz3 = jax.random.split(key, 6)

    # Parameter shapes match the module's __init__:
    w = jax.random.normal(kw, (D, 1), dtype=jnp.float32)     # torch.randn(D, 1)
    u = jnp.zeros((1, D), dtype=jnp.float32)                  # torch.zeros(1, D)
    b = jax.random.normal(kb, (1, 1), dtype=jnp.float32)      # torch.randn(1, 1)
    z = jax.random.normal(kz, (N, D), dtype=jnp.float32)

    out, logdet = planar_flow_forward(z, w, u, b, return_logabsdet=True)
    out, logdet = jax.block_until_ready((out, logdet))
    ref_out, ref_logdet = planar_flow_ref(z, w, u, b)
    assert out.shape == (N, D) and logdet.shape == (N,)
    assert jnp.allclose(out, ref_out, atol=1e-4, rtol=1e-4)
    assert jnp.allclose(logdet, ref_logdet, atol=1e-4, rtol=1e-4)

    # Ragged batch (exercises the pure-JAX tail epilogue), non-trivial u_hat,
    # multi-block pipelined grid via a tiny block_bytes override.
    N2 = 250
    u2 = 0.1 * jax.random.normal(ku, (1, D), dtype=jnp.float32)
    z2 = jax.random.normal(kz2, (N2, D), dtype=jnp.float32)
    out2, logdet2 = planar_flow_forward(z2, w, u2, b, return_logabsdet=True,
                                        block_bytes=8192)   # -> 4 grid steps
    out2, logdet2 = jax.block_until_ready((out2, logdet2))
    ref_out2, ref_logdet2 = planar_flow_ref(z2, w, u2, b)
    assert out2.shape == (N2, D) and logdet2.shape == (N2,)
    assert jnp.allclose(out2, ref_out2, atol=1e-4, rtol=1e-4)
    assert jnp.allclose(logdet2, ref_logdet2, atol=1e-4, rtol=1e-4)

    # Forward-only variant (skips logdet math, output stream and its VMEM).
    out3 = planar_flow_forward(z2, w, u2, b, return_logabsdet=False,
                               block_bytes=8192)
    out3 = jax.block_until_ready(out3)
    assert jnp.allclose(out3, ref_out2, atol=1e-4, rtol=1e-4)

    # bf16 input: native-dtype HBM streaming, cast inside the kernel.
    z3 = jax.random.normal(kz3, (64, D), dtype=jnp.float32).astype(jnp.bfloat16)
    out4, logdet4 = planar_flow_forward(z3, w, u2, b, return_logabsdet=True)
    out4, logdet4 = jax.block_until_ready((out4, logdet4))
    ref_out4, ref_logdet4 = planar_flow_ref(z3.astype(jnp.float32), w, u2, b)
    assert out4.dtype == jnp.bfloat16 and out4.shape == (64, D)
    assert jnp.allclose(out4.astype(jnp.float32), ref_out4, atol=2e-2, rtol=2e-2)
    assert jnp.allclose(logdet4, ref_logdet4, atol=1e-3, rtol=1e-2)

    print("KERNEL_OK")
</pallas_src>

<mosaic_0001>
module attributes {stable_mosaic.version = 11 : i64} {
  func.func @_planar_flow_kernel_logdet(%arg0: i32, %arg1: memref<2xf32, #tpu.memory_space<smem>>, %arg2: memref<8x128xf32, #tpu.memory_space<vmem>>, %arg3: memref<128x4xf32, #tpu.memory_space<vmem>>, %arg4: memref<4x128xf32, #tpu.memory_space<vmem>>, %arg5: memref<8x128xf32, #tpu.memory_space<vmem>>, %arg6: memref<8x4xf32, #tpu.memory_space<vmem>>) attributes {dimension_semantics = [#tpu.dimension_semantics<parallel>], iteration_bounds = array<i64: 1>, scalar_prefetch = 0 : i64, scratch_operands = 0 : i64, tpu.core_type = #tpu.core_type<tc>, window_params = [{transform_indices = @transform_0, window_bounds = array<i64: 2>}, {transform_indices = @transform_1, window_bounds = array<i64: 8, 128>}, {pipeline_mode = #tpu.pipeline_mode<synchronous>, transform_indices = @transform_2, window_bounds = array<i64: 128, 4>}, {pipeline_mode = #tpu.pipeline_mode<synchronous>, transform_indices = @transform_3, window_bounds = array<i64: 4, 128>}, {transform_indices = @transform_4, window_bounds = array<i64: 8, 128>}, {transform_indices = @transform_5, window_bounds = array<i64: 8, 4>}]} {
    %c0 = arith.constant 0 : index
    %0 = memref.load %arg1[%c0] : memref<2xf32, #tpu.memory_space<smem>>
    %c0_0 = arith.constant 0 : index
    %c0_1 = arith.constant 0 : index
    %1 = vector.load %arg2[%c0_0, %c0_1] : memref<8x128xf32, #tpu.memory_space<vmem>>, vector<8x128xf32>
    %c0_2 = arith.constant 0 : index
    %c0_3 = arith.constant 0 : index
    %2 = vector.load %arg3[%c0_2, %c0_3] : memref<128x4xf32, #tpu.memory_space<vmem>>, vector<128x4xf32>
    %cst = arith.constant dense<0.000000e+00> : vector<8x4xf32>
    %3 = tpu.matmul %1, %2, %cst {dimension_numbers = #tpu.dot_dimension_numbers<[1], [0], [0], [1], [0, 0, 1, 1], [], []>, precision = #tpu.contract_precision<fp32>} : vector<8x128xf32>, vector<128x4xf32>, vector<8x4xf32> -> vector<8x4xf32>
    %4 = vector.broadcast %0 : f32 to vector<8x4xf32>
    %5 = arith.addf %3, %4 : vector<8x4xf32>
    %6 = math.tanh %5 : vector<8x4xf32>
    %c0_4 = arith.constant 0 : index
    %c0_5 = arith.constant 0 : index
    %7 = vector.load %arg4[%c0_4, %c0_5] : memref<4x128xf32, #tpu.memory_space<vmem>>, vector<4x128xf32>
    %cst_6 = arith.constant dense<0.000000e+00> : vector<8x128xf32>
    %8 = tpu.matmul %6, %7, %cst_6 {dimension_numbers = #tpu.dot_dimension_numbers<[1], [0], [0], [1], [0, 0, 1, 1], [], []>, precision = #tpu.contract_precision<fp32>} : vector<8x4xf32>, vector<4x128xf32>, vector<8x128xf32> -> vector<8x128xf32>
    %9 = arith.addf %1, %8 : vector<8x128xf32>
    %c0_7 = arith.constant 0 : index
    %c0_8 = arith.constant 0 : index
    %10 = vector.load %arg5[%c0_7, %c0_8] : memref<8x128xf32, #tpu.memory_space<vmem>>, vector<8x128xf32>
    tpu.vector_store %arg5[%c0_7, %c0_8], %9 {strides = array<i32>} : memref<8x128xf32, #tpu.memory_space<vmem>>, vector<8x128xf32>,
    %c1 = arith.constant 1 : index
    %11 = memref.load %arg1[%c1] : memref<2xf32, #tpu.memory_space<smem>>
    %12 = arith.mulf %6, %6 : vector<8x4xf32>
    %cst_9 = arith.constant 1.000000e+00 : f32
    %13 = vector.broadcast %cst_9 : f32 to vector<8x4xf32>
    %14 = arith.subf %13, %12 : vector<8x4xf32>
    %15 = vector.broadcast %11 : f32 to vector<8x4xf32>
    %16 = arith.mulf %14, %15 : vector<8x4xf32>
    %cst_10 = arith.constant 1.000000e+00 : f32
    %17 = vector.broadcast %cst_10 : f32 to vector<8x4xf32>
    %18 = arith.addf %17, %16 : vector<8x4xf32>
    %19 = math.absf %18 : vector<8x4xf32>
    %20 = math.log %19 : vector<8x4xf32>
    %c0_11 = arith.constant 0 : index
    %c0_12 = arith.constant 0 : index
    %21 = vector.load %arg6[%c0_11, %c0_12] : memref<8x4xf32, #tpu.memory_space<vmem>>, vector<8x4xf32>
    tpu.vector_store %arg6[%c0_11, %c0_12], %20 {strides = array<i32>} : memref<8x4xf32, #tpu.memory_space<vmem>>, vector<8x4xf32>,
    return
  }
  func.func @transform_0(%arg0: i32) -> i32 {
    %c0_i32 = arith.constant 0 : i32
    %c0_i32_0 = arith.constant 0 : i32
    return %c0_i32 : i32
  }
  func.func @transform_1(%arg0: i32) -> (i32, i32) {
    %c0_i32 = arith.constant 0 : i32
    %c0_i32_0 = arith.constant 0 : i32
    return %arg0, %c0_i32 : i32, i32
  }
  func.func @transform_2(%arg0: i32) -> (i32, i32) {
    %c0_i32 = arith.constant 0 : i32
    %c0_i32_0 = arith.constant 0 : i32
    %c0_i32_1 = arith.constant 0 : i32
    return %c0_i32, %c0_i32_0 : i32, i32
  }
  func.func @transform_3(%arg0: i32) -> (i32, i32) {
    %c0_i32 = arith.constant 0 : i32
    %c0_i32_0 = arith.constant 0 : i32
    %c0_i32_1 = arith.constant 0 : i32
    return %c0_i32, %c0_i32_0 : i32, i32
  }
  func.func @transform_4(%arg0: i32) -> (i32, i32) {
    %c0_i32 = arith.constant 0 : i32
    %c0_i32_0 = arith.constant 0 : i32
    return %arg0, %c0_i32 : i32, i32
  }
  func.func @transform_5(%arg0: i32) -> (i32, i32) {
    %c0_i32 = arith.constant 0 : i32
    %c0_i32_0 = arith.constant 0 : i32
    return %arg0, %c0_i32 : i32, i32
  }
}

</mosaic_0001>

<bundles_post_ra>
// kernel: tpu_custom_call.1
= control target key start
LH: loop header
LB: loop body
LE: loop exit
PB: predicated region body
PF: predicated region fallthrough
CT: control target
= control target key end

     0   :  { %11 = vsyncpa [#allocation4], 0  ;;  %s1018_s0 = inlined_call_operand.vmem [shape: f32[2], index: 0, kind: input, shape index: {}]   ;;  %s1019_s1 = inlined_call_operand.vmem [shape: f32[2,128], index: 1, kind: input, shape index: {}]   ;;  %s1020_s2 = inlined_call_operand.vmem [shape: f32[128,4], index: 2, kind: input, shape index: {}]   ;;  %s1021_s3 = inlined_call_operand.vmem [shape: f32[4,128], index: 3, kind: input, shape index: {}]   ;;  %s1022_s4 = inlined_call_operand.hbm [shape: f32[2,128], index: 4, kind: output, shape index: {0}]   ;;  %s1023_s5 = inlined_call_operand.hbm [shape: f32[2,4], index: 5, kind: output, shape index: {1}]  }
   0x1   :  { %12 = vsyncpa [#allocation3], 0 }
   0x2   :  { %13 = vsyncpa [#allocation7], 0  ;;  %s19_s20 = sshll.u32 %s1018_s0, 4  ;;  %s675_s21 = smov [#allocation2]   ;;  %s20_s20 = int_to_ptr.vmem [resolvable:$true] %s19_s20 }
   0x3   :  { %22 = dma.vmem_to_smem %s20_s20, 16, %s675_s21, [#allocation4]  }
   0x4   :  { %669 = dma.done.wait [#allocation4], 16  }
   0x5   :  { %670 = vsyncadd [#allocation4], 4294967280 }
   0x6   :  { %33 = sfence }
   0x7   :  { %v51_v0 = vld [vmem:[%s1020_s2 + $0x78] sm:$0xff]  ;;  %v50_v1 = vld [vmem:[%s1020_s2 + $0x70] sm:$0xff]  ;;  %v49_v2 = vld [vmem:[%s1020_s2 + $0x68] sm:$0xff]  ;;  %vm400_vm0 = vcmask 1043456   ;;  %s34_s29 = sld [smem:[#allocation2]]  ;;  %vm396_vm1 = vcmask 31744  }
   0x8   :  { %v722_v3 = vand.u32 4294901760, %v51_v0  ;;  %v724_v4 = vand.u32 4294901760, %v50_v1  ;;  %v726_v5 = vand.u32 4294901760, %v49_v2  ;;  %v48_v6 = vld [vmem:[%s1020_s2 + $0x60] sm:$0xff]  ;;  %v47_v7 = vld [vmem:[%s1020_s2 + $0x58] sm:$0xff]  ;;  %v46_v8 = vld [vmem:[%s1020_s2 + $0x50] sm:$0xff] }
   0x9   :  { %v737_v9 = vand.u32 4294901760, %v48_v6  ;;  %v739_v10 = vand.u32 4294901760, %v47_v7  ;;  %v741_v11 = vand.u32 4294901760, %v46_v8  ;;  %v45_v12 = vld [vmem:[%s1020_s2 + $0x48] sm:$0xff]  ;;  %v44_v13 = vld [vmem:[%s1020_s2 + $0x40] sm:$0xff]  ;;  %v43_v21 = vld [vmem:[%s1020_s2 + $0x38] sm:$0xff] }
   0xa   :  { %54 = vmatpush.msra.mxu0 %v722_v3  ;;  %v751_v14 = vsub.f32 %v51_v0, %v722_v3  ;;  %v754_v15 = vsub.f32 %v50_v1, %v724_v4  ;;  %v757_v16 = vsub.f32 %v49_v2, %v726_v5  ;;  %v759_v17 = vand.u32 4294901760, %v45_v12  ;;  %250 = vmatpush.msra.mxu3 %v722_v3  ;;  %v42_v34 = vld [vmem:[%s1020_s2 + $0x30] sm:$0xff]  ;;  %v41_v35 = vld [vmem:[%s1020_s2 + $0x28] sm:$0xff]  ;;  %v40_v42 = vld [vmem:[%s1020_s2 + $0x20] sm:$0xff] }
   0xb   :  { %v763_v18 = vsub.f32 %v48_v6, %v737_v9  ;;  %v766_v19 = vsub.f32 %v47_v7, %v739_v10  ;;  %v768_v20 = vand.u32 4294901760, %v44_v13  ;;  %v778_v25 = vsub.f32 %v46_v8, %v741_v11  ;;  %v39_v47 = vld [vmem:[%s1020_s2 + $0x18] sm:$0xff]  ;;  %v38_v53 = vld [vmem:[%s1020_s2 + $0x10] sm:$0xff]  ;;  %v37_v61 = vld [vmem:[%s1020_s2 + $0x8] sm:$0xff] }
   0xc   :  { %56 = vmatpush.msra.mxu0 %v724_v4  ;;  %v96_v22 = vand.u32 4294901760, %v751_v14  ;;  %v102_v23 = vand.u32 4294901760, %v754_v15  ;;  %v108_v24 = vand.u32 4294901760, %v757_v16  ;;  %197 = vmatpush.msra.mxu2 %v751_v14  ;;  %v784_v28 = vsub.f32 %v45_v12, %v759_v17  ;;  %v36_v2 = vld [vmem:[%s1020_s2] sm:$0xff] }
   0xd   :  { %v114_v26 = vand.u32 4294901760, %v763_v18  ;;  %v120_v27 = vand.u32 4294901760, %v766_v19  ;;  %252 = vmatpush.msra.mxu3 %v724_v4  ;;  %v797_v32 = vand.u32 4294901760, %v43_v21  ;;  %v801_v33 = vsub.f32 %v44_v13, %v768_v20 }
   0xe   :  { %v97_v29 = vsub.f32 %v751_v14, %v96_v22  ;;  %58 = vmatpush.msra.mxu0 %v726_v5  ;;  %v103_v30 = vsub.f32 %v754_v15, %v102_v23  ;;  %v109_v31 = vsub.f32 %v757_v16, %v108_v24  ;;  %200 = vmatpush.msra.mxu2 %v754_v15  ;;  %v126_v39 = vand.u32 4294901760, %v778_v25 }
   0xf   :  { %254 = vmatpush.msra.mxu3 %v726_v5  ;;  %v115_v38 = vsub.f32 %v763_v18, %v114_v26  ;;  %v121_v40 = vsub.f32 %v766_v19, %v120_v27  ;;  %v132_v41 = vand.u32 4294901760, %v784_v28  ;;  %v825_v44 = vand.u32 4294901760, %v42_v34 }
  0x10   :  { %v98_v36 = vand.u32 4294901760, %v97_v29  ;;  %v104_v37 = vand.u32 4294901760, %v103_v30  ;;  %60 = vmatpush.msra.mxu0 %v737_v9  ;;  %203 = vmatpush.msra.mxu2 %v757_v16  ;;  %v110_v43 = vand.u32 4294901760, %v109_v31  ;;  %v828_v45 = vsub.f32 %v43_v21, %v797_v32  ;;  %v900_v29 = vld [vmem:[%s1019_s1] sm:$0xff] }
  0x11   :  { %256 = vmatpush.msra.mxu3 %v737_v9  ;;  %v830_v46 = vand.u32 4294901760, %v41_v35  ;;  %v138_v48 = vand.u32 4294901760, %v801_v33  ;;  %v116_v49 = vand.u32 4294901760, %v115_v38  ;;  %v127_v50 = vsub.f32 %v778_v25, %v126_v39 }
  0x12   :  { %99 = vmatpush.msra.mxu1 %v98_v36  ;;  %62 = vmatpush.msra.mxu0 %v739_v10  ;;  %v843_v51 = vsub.f32 %v42_v34, %v825_v44  ;;  %v845_v52 = vand.u32 4294901760, %v40_v42  ;;  %v850_v54 = vand.u32 4294901760, %v39_v47  ;;  %v122_v55 = vand.u32 4294901760, %v121_v40 }
  0x13   :  { %206 = vmatpush.msra.mxu2 %v763_v18  ;;  %258 = vmatpush.msra.mxu3 %v739_v10  ;;  %v133_v56 = vsub.f32 %v784_v28, %v132_v41  ;;  %v144_v57 = vand.u32 4294901760, %v828_v45  ;;  %v860_v58 = vsub.f32 %v41_v35, %v830_v46  ;;  %v139_v59 = vsub.f32 %v801_v33, %v138_v48 }
  0x14   :  { %105 = vmatpush.msra.mxu1 %v104_v37  ;;  %64 = vmatpush.msra.mxu0 %v741_v11  ;;  %v865_v60 = vand.u32 4294901760, %v38_v53  ;;  %v128_v62 = vand.u32 4294901760, %v127_v50  ;;  %v150_v63 = vand.u32 4294901760, %v843_v51  ;;  %v875_v0 = vsub.f32 %v40_v42, %v845_v52 }
  0x15   :  { %209 = vmatpush.msra.mxu2 %v766_v19  ;;  %260 = vmatpush.msra.mxu3 %v741_v11  ;;  %v878_v1 = vsub.f32 %v39_v47, %v850_v54  ;;  %v134_v6 = vand.u32 4294901760, %v133_v56  ;;  %v145_v7 = vsub.f32 %v828_v45, %v144_v57  ;;  %v156_v8 = vand.u32 4294901760, %v860_v58 }
  0x16   :  { %111 = vmatpush.msra.mxu1 %v110_v43  ;;  %66 = vmatpush.msra.mxu0 %v759_v17  ;;  %v890_v12 = vand.u32 4294901760, %v37_v61  ;;  %v140_v13 = vand.u32 4294901760, %v139_v59  ;;  %v893_v21 = vsub.f32 %v38_v53, %v865_v60  ;;  %v151_v30 = vsub.f32 %v843_v51, %v150_v63 }
  0x17   :  { %212 = vmatpush.msra.mxu2 %v778_v25  ;;  %262 = vmatpush.msra.mxu3 %v759_v17  ;;  %v162_v31 = vand.u32 4294901760, %v875_v0  ;;  %v907_v34 = vand.u32 4294901760, %v36_v2  ;;  %v910_v35 = vand.u32 4294901760, %v900_v29  ;;  %v168_v36 = vand.u32 4294901760, %v878_v1 }
  0x18   :  { %117 = vmatpush.msra.mxu1 %v116_v49  ;;  %68 = vmatpush.msra.mxu0 %v768_v20  ;;  %v146_v37 = vand.u32 4294901760, %v145_v7  ;;  %v157_v38 = vsub.f32 %v860_v58, %v156_v8  ;;  %v920_v40 = vsub.f32 %v37_v61, %v890_v12  ;;  %v152_v43 = vand.u32 4294901760, %v151_v30 }
  0x19   :  { %215 = vmatpush.msra.mxu2 %v784_v28  ;;  %264 = vmatpush.msra.mxu3 %v768_v20  ;;  %v86_v42 = vsub.f32 %v900_v29, %v910_v35  ;;  %v163_v47 = vsub.f32 %v875_v0, %v162_v31  ;;  %v174_v49 = vand.u32 4294901760, %v893_v21  ;;  %v932_v50 = vsub.f32 %v36_v2, %v907_v34 }
  0x1a   :  { %123 = vmatpush.msra.mxu1 %v122_v55  ;;  %70 = vmatpush.msra.mxu0 %v797_v32  ;;  %v158_v53 = vand.u32 4294901760, %v157_v38  ;;  %v169_v55 = vsub.f32 %v878_v1, %v168_v36  ;;  %v180_v56 = vand.u32 4294901760, %v920_v40  ;;  %v52_v14 = vstv %s34_s29 }
  0x1b   :  { %218 = vmatpush.msra.mxu2 %v801_v33  ;;  %266 = vmatpush.msra.mxu3 %v797_v32  ;;  %v87_v59 = vand.u32 4294901760, %v86_v42  ;;  %v164_v61 = vand.u32 4294901760, %v163_v47  ;;  %v186_v2 = vand.u32 4294901760, %v932_v50 }
  0x1c   :  { %129 = vmatpush.msra.mxu1 %v128_v62  ;;  %72 = vmatpush.msra.mxu0 %v825_v44  ;;  %v175_v62 = vsub.f32 %v893_v21, %v174_v49  ;;  %v181_v7 = vsub.f32 %v920_v40, %v180_v56 }
  0x1d   :  { %221 = vmatpush.msra.mxu2 %v828_v45  ;;  %268 = vmatpush.msra.mxu3 %v825_v44 }
  0x1e   :  { %135 = vmatpush.msra.mxu1 %v134_v6  ;;  %74 = vmatpush.msra.mxu0 %v830_v46  ;;  %v170_v6 = vand.u32 4294901760, %v169_v55  ;;  %v176_v30 = vand.u32 4294901760, %v175_v62  ;;  %v182_v38 = vand.u32 4294901760, %v181_v7 }
  0x1f   :  { %224 = vmatpush.msra.mxu2 %v843_v51  ;;  %270 = vmatpush.msra.mxu3 %v830_v46 }
  0x20   :  { %141 = vmatpush.msra.mxu1 %v140_v13  ;;  %76 = vmatpush.msra.mxu0 %v845_v52  ;;  %v88_v13 = vsub.f32 %v86_v42, %v87_v59 }
  0x21   :  { %227 = vmatpush.msra.mxu2 %v860_v58  ;;  %272 = vmatpush.msra.mxu3 %v845_v52 }
  0x22   :  { %147 = vmatpush.msra.mxu1 %v146_v37  ;;  %78 = vmatpush.msra.mxu0 %v850_v54  ;;  %v187_v37 = vsub.f32 %v932_v50, %v186_v2 }
  0x23   :  { %230 = vmatpush.msra.mxu2 %v875_v0  ;;  %274 = vmatpush.msra.mxu3 %v850_v54 }
  0x24   :  { %153 = vmatpush.msra.mxu1 %v152_v43  ;;  %80 = vmatpush.msra.mxu0 %v865_v60  ;;  %v89_v43 = vand.u32 4294901760, %v88_v13  ;;  %v188_v47 = vand.u32 4294901760, %v187_v37 }
  0x25   :  { %233 = vmatpush.msra.mxu2 %v878_v1  ;;  %276 = vmatpush.msra.mxu3 %v865_v60 }
  0x26   :  { %159 = vmatpush.msra.mxu1 %v158_v53  ;;  %82 = vmatpush.msra.mxu0 %v890_v12 }
  0x27   :  { %236 = vmatpush.msra.mxu2 %v893_v21  ;;  %278 = vmatpush.msra.mxu3 %v890_v12 }
  0x28   :  { %165 = vmatpush.msra.mxu1 %v164_v61  ;;  %84 = vmatpush.msra.mxu0 %v907_v34 }
  0x29   :  { %239 = vmatpush.msra.mxu2 %v920_v40  ;;  %280 = vmatpush.msra.mxu3 %v907_v34 }
  0x2a   :  { %291 = vmatpush.msrb.mxu0 %v96_v22  ;;  %171 = vmatpush.msra.mxu1 %v170_v6 }
  0x2b   :  { %242 = vmatpush.msra.mxu2 %v932_v50  ;;  %284 = vmatmul.f32.vlgmr.msra.gmra.mxu3 %v87_v59 }
  0x2c   :  { %295 = vmatpush.msrb.mxu0 %v102_v23  ;;  %177 = vmatpush.msra.mxu1 %v176_v30 }
  0x2d   :  { %245 = vmatmul.f32.vlgmr.msra.gmra.mxu2 %v86_v42  ;;  %90 = vmatmul.f32.vlgmr.msra.gmra.mxu0 %v89_v43 }
  0x2e   :  { %299 = vmatpush.msrb.mxu0 %v108_v24  ;;  %183 = vmatpush.msra.mxu1 %v182_v38 }
  0x30   :  { %303 = vmatpush.msrb.mxu0 %v114_v26  ;;  %189 = vmatpush.msra.mxu1 %v188_v47 }
  0x31   :  { %191 = vmatmul.f32.vlgmr.msra.gmra.mxu1 %v910_v35 }
  0x32   :  { %358 = vmatpush.msrb.mxu1 %v722_v3  ;;  %307 = vmatpush.msrb.mxu0 %v120_v27  ;;  %v395_v3 = vld [vmem:[%s1021_s3] sm:$0xf]  ;;  %s599_s3 = sld [smem:[#allocation2 + $0x1]] }
  0x34   :  { %360 = vmatpush.msrb.mxu1 %v724_v4  ;;  %311 = vmatpush.msrb.mxu0 %v126_v39  ;;  %v402_v4 = vsel %vm400_vm0, %v395_v3, 0 }
  0x36   :  { %362 = vmatpush.msrb.mxu1 %v726_v5  ;;  %315 = vmatpush.msrb.mxu0 %v132_v41  ;;  %v419_v5 = vand.u32 4294901760, %v402_v4 }
  0x38   :  { %364 = vmatpush.msrb.mxu1 %v737_v9  ;;  %319 = vmatpush.msrb.mxu0 %v138_v48  ;;  %v446_v9 = vsub.f32 %v402_v4, %v419_v5  ;;  %v555_v41 = vstv %s599_s3 }
  0x39   :  { %420 = vmatpush.msrb.mxu2 %v419_v5 }
  0x3a   :  { %366 = vmatpush.msrb.mxu1 %v739_v10  ;;  %323 = vmatpush.msrb.mxu0 %v144_v57  ;;  %v447_v10 = vand.u32 4294901760, %v446_v9 }
  0x3b   :  { %473 = vmatpush.msra.mxu2 %v446_v9 }
  0x3c   :  { %368 = vmatpush.msrb.mxu1 %v741_v11  ;;  %327 = vmatpush.msrb.mxu0 %v150_v63  ;;  %v448_v11 = vsub.f32 %v446_v9, %v447_v10 }
  0x3e   :  { %370 = vmatpush.msrb.mxu1 %v759_v17  ;;  %331 = vmatpush.msrb.mxu0 %v156_v8  ;;  %v449_v16 = vand.u32 4294901760, %v448_v11 }
  0x40   :  { %372 = vmatpush.msrb.mxu1 %v768_v20  ;;  %335 = vmatpush.msrb.mxu0 %v162_v31 }
  0x41   :  { %450 = vmatpush.msrb.mxu3 %v449_v16 }
  0x42   :  { %374 = vmatpush.msrb.mxu1 %v797_v32  ;;  %339 = vmatpush.msrb.mxu0 %v168_v36 }
  0x43   :  { %496 = vmatpush.msra.mxu3 %v419_v5 }
  0x44   :  { %376 = vmatpush.msrb.mxu1 %v825_v44  ;;  %343 = vmatpush.msrb.mxu0 %v174_v49 }
  0x46   :  { %378 = vmatpush.msrb.mxu1 %v830_v46  ;;  %347 = vmatpush.msrb.mxu0 %v180_v56 }
  0x48   :  { %380 = vmatpush.msrb.mxu1 %v845_v52  ;;  %351 = vmatpush.msrb.mxu0 %v186_v2 }
  0x49   :  { %353 = vmatmul.f32.vlgmr.msrb.gmra.mxu0 %v910_v35 }
  0x4a   :  { %382 = vmatpush.msrb.mxu1 %v850_v54 }
  0x4c   :  { %384 = vmatpush.msrb.mxu1 %v865_v60 }
  0x4e   :  { %386 = vmatpush.msrb.mxu1 %v890_v12 }
  0x50   :  { %388 = vmatpush.msrb.mxu1 %v907_v34 }
  0x51   :  { %390 = vmatmul.f32.vlgmr.msrb.gmra.mxu1 %v910_v35 }
  0xaa   :  { %v91_v15 = vpop.f32.mrf.mxu0 }
  0xab   :  { %v92_v17 = vadd.f32 %v91_v15, %v52_v14 }
  0xae   :  { %v192_v18 = vpop.f32.mrf.mxu1  ;;  %v285_v23 = vpop.f32.mrf.mxu3 }
  0xaf   :  { %v193_v19 = vadd.f32 %v192_v18, %v92_v17 }
  0xb0   :  { %v246_v20 = vpop.f32.mrf.mxu2 }
  0xb1   :  { %v247_v22 = vadd.f32 %v246_v20, %v193_v19 }
  0xb3   :  { %v286_v24 = vadd.f32 %v285_v23, %v247_v22 }
  0xc6   :  { %v354_v25 = vpop.f32.mrf.mxu0 }
  0xc7   :  { %v355_v26 = vadd.f32 %v354_v25, %v286_v24 }
  0xce   :  { %v391_v27 = vpop.f32.mrf.mxu1 }
  0xcf   :  { %v392_v28 = vadd.f32 %v391_v27, %v355_v26 }
  0xd1   :  { %605 = vtanh.f32 %v392_v28 }
  0xd7   :  { %v606_v32 = vpop.eup %605 }
  0xd8   :  { %v398_v33 = vsel %vm396_vm1, %v606_v32, 0  ;;  %v553_v39 = vmul.f32 %v606_v32, %v606_v32 }
  0xd9   :  { %v421_v44 = vand.u32 4294901760, %v398_v33 }
  0xda   :  { %v554_v45 = vsub.f32 1.0, %v553_v39 }
  0xdb   :  { %452 = vmatmul.f32.vlgmr.msrb.gmra.mxu3 %v421_v44  ;;  %v422_v46 = vsub.f32 %v398_v33, %v421_v44 }
  0xdc   :  { %v556_v48 = vmul.f32 %v555_v41, %v554_v45  ;;  %544 = vmatpush.msrb.mxu3 %v419_v5 }
  0xdd   :  { %v423_v51 = vand.u32 4294901760, %v422_v46 }
  0xde   :  { %v557_v52 = vadd.f32 1.0, %v556_v48 }
  0xdf   :  { %v424_v54 = vsub.f32 %v422_v46, %v423_v51 }
  0xe0   :  { %v558_v57 = vand.u32 2147483647, %v557_v52 }
  0xe1   :  { %v425_v58 = vand.u32 4294901760, %v424_v54 }
  0xe2   :  { %607 = vlog2.f32 %v558_v57 }
  0xe3   :  { %426 = vmatmul.f32.vlgmr.msrb.gmra.mxu2 %v425_v58  ;;  %500 = vmatmul.f32.vlgmr.msra.gmra.mxu3 %v423_v51 }
  0xe4   :  { %522 = vmatpush.msrb.mxu2 %v447_v10 }
  0xe8   :  { %v608_v60 = vpop.eup %607 }
  0xe9   :  { %v560_v63 = vmul.f32 0.6931472, %v608_v60 }
  0xeb   :  { %561 = vst.msk [vmem:[#allocation6] sm:$0xff] %vm396_vm1, %v560_v63  ;;  %476 = vmatmul.f32.vlgmr.msra.gmra.mxu2 %v422_v46  ;;  %546 = vmatmul.f32.vlgmr.msrb.gmra.mxu3 %v421_v44 }
  0xf3   :  { %524 = vmatmul.f32.vlgmr.msrb.gmra.mxu2 %v421_v44 }
 0x15e   :  { %v453_v0 = vpop.f32.mrf.mxu3 }
 0x166   :  { %v427_v1 = vpop.f32.mrf.mxu2  ;;  %v501_v8 = vpop.f32.mrf.mxu3 }
 0x167   :  { %v454_v21 = vadd.f32 %v453_v0, %v427_v1 }
 0x16e   :  { %v477_v12 = vpop.f32.mrf.mxu2  ;;  %v547_v40 = vpop.f32.mrf.mxu3 }
 0x16f   :  { %v478_v31 = vadd.f32 %v477_v12, %v454_v21 }
 0x171   :  { %v502_v34 = vadd.f32 %v501_v8, %v478_v31 }
 0x176   :  { %v525_v35 = vpop.f32.mrf.mxu2 }
 0x177   :  { %v526_v36 = vadd.f32 %v525_v35, %v502_v34 }
 0x179   :  { %v548_v42 = vadd.f32 %v547_v40, %v526_v36 }
 0x17b   :  { %v550_v49 = vadd.f32 %v548_v42, %v900_v29 }
 0x17d   :  { %551 = vst [vmem:[#allocation5] sm:$0xff] %v550_v49 }
 0x17e   :  { %565 = vsyncadd [#allocation3], 96  ;;  %s568_s7 = sshll.u32 %s1022_s4, 4  ;;  %s676_s8 = smov [#allocation5]   ;;  %s569_s7 = int_to_ptr.hbm [resolvable:$true] %s568_s7 }
 0x17f   :  { %s566_s9 = sshll.u32 %s676_s8, 4  ;;  %s677_s10 = smov 32   ;;  %s567_s9 = int_to_ptr.vmem [resolvable:$true] %s566_s9 }
 0x180   :  { %s678_s11 = smov 2  }
 0x181   :  { %574 = dma.vmem_to_hbm [thread:$0]  %s567_s9, 32, %s569_s7, [#allocation3], %s677_s10, %s677_s10, %s678_s11  }
 0x182   :  { %578 = vsyncadd [#allocation7], 96  ;;  %s581_s14 = sshll.u32 %s1023_s5, 4  ;;  %s679_s15 = smov [#allocation6]   ;;  %s582_s14 = int_to_ptr.hbm [resolvable:$true] %s581_s14 }
 0x183   :  { %s579_s16 = sshll.u32 %s679_s15, 4  ;;  %s580_s16 = int_to_ptr.vmem [resolvable:$true] %s579_s16 }
 0x184   :  { %587 = dma.vmem_to_hbm [thread:$0]  %s580_s16, 32, %s582_s14, [#allocation7], %s677_s10, %s677_s10, %s678_s11  }
 0x185   :  { %671 = dma.done.wait [#allocation3], 128  }
 0x186   :  { %672 = vsyncadd [#allocation3], 4294967168 }
 0x187   :  { %673 = dma.done.wait [#allocation7], 128  }
 0x188   :  { %674 = vsyncadd [#allocation7], 4294967168 }
 0x189   :  { %596 = vsyncpa [#allocation3], 1 }
 0x18a   :  { %597 = vsyncpa [#allocation7], 1 }
 0x18b   :  { %598 = vsyncpa [#allocation4], 1 }

</bundles_post_ra>
